<compile_context>
chip_gen: v6e
topology: v6e:2x2x1
jax: 0.10.0
libtpu: 0.0.40
codegen_flags: <defaults>
</compile_context>

<pallas_src>
import math

import jax
import jax.numpy as jnp
from jax import lax
from jax.experimental import pallas as pl
from jax.experimental.pallas import tpu as pltpu

IN_DIM = 16
HID_DIMS = (32, 32)
OUT_DIM = 8


def _round_up(n, m):
    return ((n + m - 1) // m) * m


def _mish_fast(x):
    # mish(x) = x * tanh(softplus(x)) = x * n/(n+2) = x - 2x/(n+2),
    # with n = e*(e+2), e = exp(x).  Exact identity, no clamp/select needed:
    #   x -> +inf : e, n -> inf, 1/(n+2) -> 0   => y -> x
    #   x -> -inf : e, n -> 0,   1/(n+2) -> 0.5 => y -> x - x = 0
    # The approximate reciprocal runs on the EUP slot (idle otherwise).
    e = jnp.exp(x)
    n = e * (e + 2.0)
    return x - 2.0 * x * pl.reciprocal(n + 2.0, approx=True)


def simple_fcn_kernel(x_ref, w1_ref, b1_ref, w2_ref, b2_ref, w3_ref, b3_ref, o_ref):
    # x_ref: (bt, IN_DIM) block in the native row-major layout of x.
    x = x_ref[...]

    # h1 = W1 @ x^T + b1 -> (H1, bt): batch on the 128-lane axis for all
    # elementwise (VPU/EUP) work.  Contraction over dim 1 of both operands
    # (the well-supported A @ B^T form, same as q @ k^T in attention).
    h1 = lax.dot_general(w1_ref[...], x, (((1,), (1,)), ((), ())),
                         preferred_element_type=jnp.float32) + b1_ref[...]
    h1 = _mish_fast(h1)

    h2 = jnp.dot(w2_ref[...], h1, preferred_element_type=jnp.float32) + b2_ref[...]
    h2 = _mish_fast(h2)

    out = jnp.dot(w3_ref[...], h2, preferred_element_type=jnp.float32) + b3_ref[...]
    # Transpose the small (OUT_DIM, bt) result in-kernel (XLU slot is idle) so
    # the output block is written in the module's native (B, OUT_DIM) layout.
    o_ref[...] = jnp.transpose(out).astype(o_ref.dtype)


def simple_fcn_forward(x, params, *, batch_tile=8192):
    """x: (B, IN_DIM) float32.  params: w{1,2,3}: (out,in), b{1,2,3}: (out,1)."""
    B = x.shape[0]

    # Batch tile: second-minor axis of the x/out blocks (multiple of 8), and the
    # lane axis of the hidden activations (multiple of 128 once large).
    bt = max(8, min(batch_tile, B))
    bt = _round_up(bt, 128 if bt >= 128 else 8)

    w1, b1 = params["w1"], params["b1"]
    w2, b2 = params["w2"], params["b2"]
    w3, b3 = params["w3"], params["b3"]

    grid = (pl.cdiv(B, bt),)   # ragged last block handled by Pallas clipping

    def resident(arr):  # whole (tiny) array, same block every step -> stays in VMEM
        return pl.BlockSpec(arr.shape, lambda i: (0,) * arr.ndim)

    weight_bytes = sum(int(a.size) * a.dtype.itemsize for a in (w1, b1, w2, b2, w3, b3))
    cost = pl.CostEstimate(
        flops=2 * B * (IN_DIM * HID_DIMS[0]
                       + HID_DIMS[0] * HID_DIMS[1]
                       + HID_DIMS[1] * OUT_DIM),
        transcendentals=2 * B * (HID_DIMS[0] + HID_DIMS[1]),   # exp + reciprocal
        bytes_accessed=4 * B * (IN_DIM + OUT_DIM) + weight_bytes,
    )

    # Per-step VMEM: double-buffered x block + double-buffered out block + f32
    # hidden temporaries (+ slack).  Set explicitly so v5e (16 MiB scoped
    # default) can take large tiles; default tile (~12 MiB) fits all chips.
    itemsize = x.dtype.itemsize
    vmem_bytes = int(2 * bt * IN_DIM * itemsize
                     + 2 * bt * OUT_DIM * itemsize
                     + 8 * bt * max(HID_DIMS) * 4
                     + (2 << 20))
    vmem_bytes = min(max(vmem_bytes, 32 << 20), 100 << 20)

    return pl.pallas_call(
        simple_fcn_kernel,
        out_shape=jax.ShapeDtypeStruct((B, OUT_DIM), x.dtype),
        grid_spec=pltpu.PrefetchScalarGridSpec(
            num_scalar_prefetch=0,
            grid=grid,
            in_specs=[
                pl.BlockSpec((bt, IN_DIM), lambda i: (i, 0)),   # contiguous row tile
                resident(w1), resident(b1),
                resident(w2), resident(b2),
                resident(w3), resident(b3),
            ],
            out_specs=pl.BlockSpec((bt, OUT_DIM), lambda i: (i, 0)),
        ),
        compiler_params=pltpu.CompilerParams(
            dimension_semantics=("parallel",),
            vmem_limit_bytes=vmem_bytes,
        ),
        cost_estimate=cost,
    )(x, w1, b1, w2, b2, w3, b3)


def init_params(key):
    """PyTorch nn.Linear default init: U[-1/sqrt(fan_in), +1/sqrt(fan_in)].
    Weights stored PyTorch-native (out_features, in_features); biases (out, 1)."""
    params = {}
    dims = (IN_DIM,) + HID_DIMS + (OUT_DIM,)
    keys = jax.random.split(key, 2 * (len(dims) - 1))
    for li in range(len(dims) - 1):
        fan_in, fan_out = dims[li], dims[li + 1]
        bound = 1.0 / math.sqrt(fan_in)
        params[f"w{li + 1}"] = jax.random.uniform(
            keys[2 * li], (fan_out, fan_in), jnp.float32, minval=-bound, maxval=bound)
        params[f"b{li + 1}"] = jax.random.uniform(
            keys[2 * li + 1], (fan_out, 1), jnp.float32, minval=-bound, maxval=bound)
    return params


def _mish_ref(x):
    # Canonical PyTorch Mish: x * tanh(softplus(x)), numerically stable softplus.
    sp = jnp.maximum(x, 0.0) + jnp.log1p(jnp.exp(-jnp.abs(x)))
    return x * jnp.tanh(sp)


def reference_forward(x, params):
    h = x
    h = _mish_ref(h @ params["w1"].T + params["b1"].T)
    h = _mish_ref(h @ params["w2"].T + params["b2"].T)
    return h @ params["w3"].T + params["b3"].T


if __name__ == "__main__":
    key = jax.random.PRNGKey(0)
    pkey, xkey = jax.random.split(key)

    params = init_params(pkey)
    B = 8
    x = jax.random.normal(xkey, (B, IN_DIM), dtype=jnp.float32)

    out = simple_fcn_forward(x, params)
    out = jax.block_until_ready(out)

    ref = reference_forward(x, params)
    assert out.shape == (B, OUT_DIM)
    # Only approximate step is the EUP approx-reciprocal inside mish; its error
    # is far below this bound.
    assert jnp.allclose(out, ref, atol=2e-3, rtol=2e-3), "mismatch vs JAX reference"

    print("KERNEL_OK")
</pallas_src>

<mosaic_0001>
module attributes {stable_mosaic.version = 11 : i64} {
  func.func @simple_fcn_kernel(%arg0: i32, %arg1: memref<8x16xf32, #tpu.memory_space<vmem>>, %arg2: memref<32x16xf32, #tpu.memory_space<vmem>>, %arg3: memref<32x1xf32, #tpu.memory_space<vmem>>, %arg4: memref<32x32xf32, #tpu.memory_space<vmem>>, %arg5: memref<32x1xf32, #tpu.memory_space<vmem>>, %arg6: memref<8x32xf32, #tpu.memory_space<vmem>>, %arg7: memref<8x1xf32, #tpu.memory_space<vmem>>, %arg8: memref<8x8xf32, #tpu.memory_space<vmem>>) attributes {dimension_semantics = [#tpu.dimension_semantics<parallel>], iteration_bounds = array<i64: 1>, scalar_prefetch = 0 : i64, scratch_operands = 0 : i64, tpu.core_type = #tpu.core_type<tc>, window_params = [{transform_indices = @transform_0, window_bounds = array<i64: 8, 16>}, {pipeline_mode = #tpu.pipeline_mode<synchronous>, transform_indices = @transform_1, window_bounds = array<i64: 32, 16>}, {pipeline_mode = #tpu.pipeline_mode<synchronous>, transform_indices = @transform_2, window_bounds = array<i64: 32, 1>}, {pipeline_mode = #tpu.pipeline_mode<synchronous>, transform_indices = @transform_3, window_bounds = array<i64: 32, 32>}, {pipeline_mode = #tpu.pipeline_mode<synchronous>, transform_indices = @transform_4, window_bounds = array<i64: 32, 1>}, {pipeline_mode = #tpu.pipeline_mode<synchronous>, transform_indices = @transform_5, window_bounds = array<i64: 8, 32>}, {pipeline_mode = #tpu.pipeline_mode<synchronous>, transform_indices = @transform_6, window_bounds = array<i64: 8, 1>}, {transform_indices = @transform_7, window_bounds = array<i64: 8, 8>}]} {
    %c0 = arith.constant 0 : index
    %c0_0 = arith.constant 0 : index
    %0 = vector.load %arg1[%c0, %c0_0] : memref<8x16xf32, #tpu.memory_space<vmem>>, vector<8x16xf32>
    %c0_1 = arith.constant 0 : index
    %c0_2 = arith.constant 0 : index
    %1 = vector.load %arg2[%c0_1, %c0_2] : memref<32x16xf32, #tpu.memory_space<vmem>>, vector<32x16xf32>
    %cst = arith.constant dense<0.000000e+00> : vector<32x8xf32>
    %2 = tpu.matmul %1, %0, %cst {dimension_numbers = #tpu.dot_dimension_numbers<[1], [1], [0], [0], [0, 0, 1, 0], [], []>} : vector<32x16xf32>, vector<8x16xf32>, vector<32x8xf32> -> vector<32x8xf32>
    %c0_3 = arith.constant 0 : index
    %c0_4 = arith.constant 0 : index
    %3 = vector.load %arg3[%c0_3, %c0_4] : memref<32x1xf32, #tpu.memory_space<vmem>>, vector<32x1xf32>
    %4 = vector.broadcast %3 : vector<32x1xf32> to vector<32x8xf32>
    %5 = arith.addf %2, %4 : vector<32x8xf32>
    %6 = math.exp %5 : vector<32x8xf32>
    %cst_5 = arith.constant 2.000000e+00 : f32
    %7 = vector.broadcast %cst_5 : f32 to vector<32x8xf32>
    %8 = arith.addf %6, %7 : vector<32x8xf32>
    %9 = arith.mulf %6, %8 : vector<32x8xf32>
    %cst_6 = arith.constant 2.000000e+00 : f32
    %10 = vector.broadcast %cst_6 : f32 to vector<32x8xf32>
    %11 = arith.mulf %10, %5 : vector<32x8xf32>
    %cst_7 = arith.constant 2.000000e+00 : f32
    %12 = vector.broadcast %cst_7 : f32 to vector<32x8xf32>
    %13 = arith.addf %9, %12 : vector<32x8xf32>
    %14 = tpu.reciprocal %13 {approx = true} : vector<32x8xf32> -> vector<32x8xf32>
    %15 = arith.mulf %11, %14 : vector<32x8xf32>
    %16 = arith.subf %5, %15 : vector<32x8xf32>
    %c0_8 = arith.constant 0 : index
    %c0_9 = arith.constant 0 : index
    %17 = vector.load %arg4[%c0_8, %c0_9] : memref<32x32xf32, #tpu.memory_space<vmem>>, vector<32x32xf32>
    %cst_10 = arith.constant dense<0.000000e+00> : vector<32x8xf32>
    %18 = tpu.matmul %17, %16, %cst_10 {dimension_numbers = #tpu.dot_dimension_numbers<[1], [0], [0], [1], [0, 0, 1, 1], [], []>} : vector<32x32xf32>, vector<32x8xf32>, vector<32x8xf32> -> vector<32x8xf32>
    %c0_11 = arith.constant 0 : index
    %c0_12 = arith.constant 0 : index
    %19 = vector.load %arg5[%c0_11, %c0_12] : memref<32x1xf32, #tpu.memory_space<vmem>>, vector<32x1xf32>
    %20 = vector.broadcast %19 : vector<32x1xf32> to vector<32x8xf32>
    %21 = arith.addf %18, %20 : vector<32x8xf32>
    %22 = math.exp %21 : vector<32x8xf32>
    %cst_13 = arith.constant 2.000000e+00 : f32
    %23 = vector.broadcast %cst_13 : f32 to vector<32x8xf32>
    %24 = arith.addf %22, %23 : vector<32x8xf32>
    %25 = arith.mulf %22, %24 : vector<32x8xf32>
    %cst_14 = arith.constant 2.000000e+00 : f32
    %26 = vector.broadcast %cst_14 : f32 to vector<32x8xf32>
    %27 = arith.mulf %26, %21 : vector<32x8xf32>
    %cst_15 = arith.constant 2.000000e+00 : f32
    %28 = vector.broadcast %cst_15 : f32 to vector<32x8xf32>
    %29 = arith.addf %25, %28 : vector<32x8xf32>
    %30 = tpu.reciprocal %29 {approx = true} : vector<32x8xf32> -> vector<32x8xf32>
    %31 = arith.mulf %27, %30 : vector<32x8xf32>
    %32 = arith.subf %21, %31 : vector<32x8xf32>
    %c0_16 = arith.constant 0 : index
    %c0_17 = arith.constant 0 : index
    %33 = vector.load %arg6[%c0_16, %c0_17] : memref<8x32xf32, #tpu.memory_space<vmem>>, vector<8x32xf32>
    %cst_18 = arith.constant dense<0.000000e+00> : vector<8x8xf32>
    %34 = tpu.matmul %33, %32, %cst_18 {dimension_numbers = #tpu.dot_dimension_numbers<[1], [0], [0], [1], [0, 0, 1, 1], [], []>} : vector<8x32xf32>, vector<32x8xf32>, vector<8x8xf32> -> vector<8x8xf32>
    %c0_19 = arith.constant 0 : index
    %c0_20 = arith.constant 0 : index
    %35 = vector.load %arg7[%c0_19, %c0_20] : memref<8x1xf32, #tpu.memory_space<vmem>>, vector<8x1xf32>
    %36 = vector.broadcast %35 : vector<8x1xf32> to vector<8x8xf32>
    %37 = arith.addf %34, %36 : vector<8x8xf32>
    %38 = tpu.transpose %37, [1, 0] : vector<8x8xf32> -> vector<8x8xf32>
    %c0_21 = arith.constant 0 : index
    %c0_22 = arith.constant 0 : index
    %39 = vector.load %arg8[%c0_21, %c0_22] : memref<8x8xf32, #tpu.memory_space<vmem>>, vector<8x8xf32>
    tpu.vector_store %arg8[%c0_21, %c0_22], %38 {strides = array<i32>} : memref<8x8xf32, #tpu.memory_space<vmem>>, vector<8x8xf32>,
    return
  }
  func.func @transform_0(%arg0: i32) -> (i32, i32) {
    %c0_i32 = arith.constant 0 : i32
    %c0_i32_0 = arith.constant 0 : i32
    return %arg0, %c0_i32 : i32, i32
  }
  func.func @transform_1(%arg0: i32) -> (i32, i32) {
    %c0_i32 = arith.constant 0 : i32
    %c0_i32_0 = arith.constant 0 : i32
    %c0_i32_1 = arith.constant 0 : i32
    return %c0_i32, %c0_i32_0 : i32, i32
  }
  func.func @transform_2(%arg0: i32) -> (i32, i32) {
    %c0_i32 = arith.constant 0 : i32
    %c0_i32_0 = arith.constant 0 : i32
    %c0_i32_1 = arith.constant 0 : i32
    return %c0_i32, %c0_i32_0 : i32, i32
  }
  func.func @transform_3(%arg0: i32) -> (i32, i32) {
    %c0_i32 = arith.constant 0 : i32
    %c0_i32_0 = arith.constant 0 : i32
    %c0_i32_1 = arith.constant 0 : i32
    return %c0_i32, %c0_i32_0 : i32, i32
  }
  func.func @transform_4(%arg0: i32) -> (i32, i32) {
    %c0_i32 = arith.constant 0 : i32
    %c0_i32_0 = arith.constant 0 : i32
    %c0_i32_1 = arith.constant 0 : i32
    return %c0_i32, %c0_i32_0 : i32, i32
  }
  func.func @transform_5(%arg0: i32) -> (i32, i32) {
    %c0_i32 = arith.constant 0 : i32
    %c0_i32_0 = arith.constant 0 : i32
    %c0_i32_1 = arith.constant 0 : i32
    return %c0_i32, %c0_i32_0 : i32, i32
  }
  func.func @transform_6(%arg0: i32) -> (i32, i32) {
    %c0_i32 = arith.constant 0 : i32
    %c0_i32_0 = arith.constant 0 : i32
    %c0_i32_1 = arith.constant 0 : i32
    return %c0_i32, %c0_i32_0 : i32, i32
  }
  func.func @transform_7(%arg0: i32) -> (i32, i32) {
    %c0_i32 = arith.constant 0 : i32
    %c0_i32_0 = arith.constant 0 : i32
    return %arg0, %c0_i32 : i32, i32
  }
}

</mosaic_0001>

<bundles_post_ra>
// kernel: tpu_custom_call.1
= control target key start
LH: loop header
LB: loop body
LE: loop exit
PB: predicated region body
PF: predicated region fallthrough
CT: control target
= control target key end

     0   :  { %vm56_vm0 = vcmask 130048   ;;  %v604_v4 = vmov 0   ;;  %s724_s0 = inlined_call_operand.vmem [shape: f32[8,16], index: 0, kind: input, shape index: {}]   ;;  %s725_s1 = inlined_call_operand.vmem [shape: f32[32,16], index: 1, kind: input, shape index: {}]   ;;  %s726_s2 = inlined_call_operand.vmem [shape: f32[32,1], index: 2, kind: input, shape index: {}]   ;;  %s727_s3 = inlined_call_operand.vmem [shape: f32[32,32], index: 3, kind: input, shape index: {}]   ;;  %s728_s4 = inlined_call_operand.vmem [shape: f32[32,1], index: 4, kind: input, shape index: {}]   ;;  %s729_s5 = inlined_call_operand.vmem [shape: f32[8,32], index: 5, kind: input, shape index: {}]   ;;  %s730_s6 = inlined_call_operand.vmem [shape: f32[8,1], index: 6, kind: input, shape index: {}]   ;;  %s731_s7 = inlined_call_operand.hbm [shape: f32[8,8], index: 7, kind: output, shape index: {}]  }
   0x1   :  { %v27_v0 = vld [vmem:[%s724_s0] sm:$0xff]  ;;  %v35_v2 = vld [vmem:[%s726_s2 + $0x18] sm:$0xff]  ;;  %v29_v3 = vld [vmem:[%s725_s1 + $0x8] sm:$0xff]  ;;  %548 = vset.pattern.permute.xlu0 %v604_v4  ;;  %549 = vset.pattern.permute.xlu1 %v604_v4 }
   0x2   :  { %v28_v1 = vld [vmem:[%s725_s1] sm:$0xff]  ;;  %511 = vmatprep.subr.msk.mxu0 %vm56_vm0, %v27_v0  ;;  %v33_v5 = vld [vmem:[%s726_s2 + $0x8] sm:$0xff]  ;;  %v30_v6 = vld [vmem:[%s725_s1 + $0x10] sm:$0xff]  ;;  %53 = vperm.xlu0 %548, %v35_v2  }
   0x3   :  { %513 = vmatprep.mubr.msk.f32.mxu0 %vm56_vm0, %v28_v1  ;;  %512 = vmatpush3.xpose.msk.msra.mxu0 %vm56_vm0, %v27_v0  ;;  %v34_v7 = vld [vmem:[%s726_s2 + $0x10] sm:$0xff] }
   0x4   :  { %43 = vperm.xlu1 %549, %v33_v5  }
   0x5   :  { %12 = vsyncpa [#allocation3], 0  ;;  %v32_v8 = vld [vmem:[%s726_s2] sm:$0xff]  ;;  %v31_v9 = vld [vmem:[%s725_s1 + $0x18] sm:$0xff]  ;;  %vm221_vm1 = vcmask 261120   ;;  %vm606_vm2 = vmmov 0  }
   0x6   :  { %514 = vmatmul.mubr.msk.f32.vlgmr.msra.gmra.mxu0 %vm56_vm0, %v29_v3  ;;  %48 = vperm.xlu0 %548, %v34_v7   ;;  %v200_v10 = vld [vmem:[%s728_s4 + $0x18] sm:$0xff]  ;;  %v199_v11 = vld [vmem:[%s728_s4 + $0x10] sm:$0xff]  ;;  %v198_v12 = vld [vmem:[%s728_s4 + $0x8] sm:$0xff]  ;;  %v605_v3 = vmov 0.0   ;;  %s607_s9 = smov [#allocation2]   ;;  %vm467_vm3 = vcmask 64512  }
   0x7   :  { %516 = vmatprep.mubr.msk.f32.mxu0 %vm56_vm0, %v30_v6  ;;  %v197_v13 = vld [vmem:[%s728_s4] sm:$0xff]  ;;  %v194_v0 = vld [vmem:[%s727_s3 + $0x8] sm:$0xff]  ;;  %v195_v1 = vld [vmem:[%s727_s3 + $0x10] sm:$0xff]  ;;  %533 = vmatprep.subr.mxu0 %v605_v3  ;;  %s475_s10 = sshll.u32 %s607_s9, 4  ;;  %s476_s10 = int_to_ptr.vmem [resolvable:$true] %s475_s10 }
   0x8   :  { %38 = vperm.xlu1 %549, %v32_v8   ;;  %v356_v14 = vld [vmem:[%s730_s6] sm:$0xff]  ;;  %v196_v2 = vld [vmem:[%s727_s3 + $0x18] sm:$0xff]  ;;  %s582_s11 = scalar_lea.vmem %s476_s10, 128  ;;  %p587_p1 = scmp.lt.s32.totalorder %s476_s10, %s476_s10 }
   0x9   :  { %v193_v15 = vld [vmem:[%s727_s3] sm:$0xff]  ;;  %p583_p0 = scmp.ne.s32.totalorder %s476_s10, %s582_s11  ;;  %p588_p2 = scmp.lt.s32.totalorder %s582_s11, %s582_s11 }
   0xa   :  { %517 = vmatmul.mubr.msk.f32.gmra.mxu0 %vm56_vm0, %v31_v9  ;;  %218 = vperm.xlu0 %548, %v200_v10  }
   0xb   :  { %527 = vmatprep.mubr.msk.f32.mxu1 %vm221_vm1, %v193_v15  ;;  %541 = vmatprep.mubr.msk.f32.mxu0 %vm606_vm2, %v605_v3  ;;  %p589_p3 = por %p588_p2, %p587_p1 }
   0xc   :  { %213 = vperm.xlu1 %549, %v199_v11  }
   0xd   :  { %p590_p4 = pnand %p589_p3, %p583_p0 }
   0xe   :  { %208 = vperm.xlu0 %548, %v198_v12  }
  0x10   :  { %203 = vperm.xlu1 %549, %v197_v13  }
  0x12   :  { %359 = vperm.xlu0 %548, %v356_v14  }
  0x7d   :  { %v54_v17 = vpop.permute.xlu0 %53 }
  0x7f   :  { %v44_v16 = vpop.permute.xlu1 %43 }
  0x81   :  { %v49_v27 = vpop.permute.xlu0 %48 }
  0x83   :  { %v39_v20 = vpop.permute.xlu1 %38 }
  0x85   :  { %v219_v4 = vpop.permute.xlu0 %218 }
  0x87   :  { %v214_v5 = vpop.permute.xlu1 %213 }
  0x89   :  { %v209_v6 = vpop.permute.xlu0 %208 }
  0x8b   :  { %v204_v9 = vpop.permute.xlu1 %203 }
  0xc6   :  { %v515_v18 = vpop.f32.mrf.mxu0 }
  0xc7   :  { %v144_v19 = vadd.f32 %v515_v18, %v44_v16 }
  0xc8   :  { %v138_v21 = vpop.f32.mrf.mxu0 }
  0xc9   :  { %v159_v22 = vmul.f32 1.442695, %v144_v19  ;;  %v139_v23 = vadd.f32 %v138_v21, %v39_v20  ;;  %v174_v52 = vmul.f32 2.0, %v144_v19 }
  0xca   :  { %v518_v24 = vpop.f32.mrf.mxu0 }
  0xcb   :  { %550 = vpow2.f32 %v159_v22  ;;  %v157_v25 = vmul.f32 1.442695, %v139_v23  ;;  %v154_v26 = vadd.f32 %v518_v24, %v54_v17  ;;  %v173_v56 = vmul.f32 2.0, %v139_v23 }
  0xcc   :  { %v148_v28 = vpop.f32.mrf.mxu0 }
  0xcd   :  { %552 = vpow2.f32 %v157_v25  ;;  %v163_v29 = vmul.f32 1.442695, %v154_v26  ;;  %v149_v30 = vadd.f32 %v148_v28, %v49_v27  ;;  %v176_v49 = vmul.f32 2.0, %v154_v26 }
  0xcf   :  { %554 = vpow2.f32 %v163_v29  ;;  %v161_v31 = vmul.f32 1.442695, %v149_v30  ;;  %v175_v53 = vmul.f32 2.0, %v149_v30 }
  0xd1   :  { %556 = vpow2.f32 %v161_v31 }
  0xd8   :  { %v551_v32 = vpop.eup %550 }
  0xd9   :  { %v166_v33 = vadd.f32 2.0, %v551_v32 }
  0xda   :  { %v553_v34 = vpop.eup %552 }
  0xdb   :  { %v170_v35 = vmul.f32 %v551_v32, %v166_v33  ;;  %v165_v36 = vadd.f32 2.0, %v553_v34 }
  0xdc   :  { %v555_v37 = vpop.eup %554 }
  0xdd   :  { %v169_v38 = vmul.f32 %v553_v34, %v165_v36  ;;  %v168_v39 = vadd.f32 2.0, %v555_v37  ;;  %v178_v41 = vadd.f32 2.0, %v170_v35 }
  0xde   :  { %v557_v40 = vpop.eup %556 }
  0xdf   :  { %v167_v42 = vadd.f32 2.0, %v557_v40  ;;  %v172_v43 = vmul.f32 %v555_v37, %v168_v39  ;;  %v177_v44 = vadd.f32 2.0, %v169_v38  ;;  %558 = vrcp.f32 %v178_v41 }
  0xe1   :  { %v171_v45 = vmul.f32 %v557_v40, %v167_v42  ;;  %v180_v46 = vadd.f32 2.0, %v172_v43 }
  0xe3   :  { %v179_v47 = vadd.f32 2.0, %v171_v45  ;;  %560 = vrcp.f32 %v180_v46 }
  0xe4   :  { %562 = vrcp.f32 %v177_v44 }
  0xe5   :  { %564 = vrcp.f32 %v179_v47 }
  0xec   :  { %v559_v48 = vpop.eup %558 }
  0xed   :  { %v186_v59 = vmul.f32 %v559_v48, %v174_v52  ;;  %v355_v52 = vld [vmem:[%s729_s5] sm:$0xff] }
  0xef   :  { %v190_v62 = vsub.f32 %v144_v19, %v186_v59 }
  0xf0   :  { %v561_v50 = vpop.eup %560 }
  0xf1   :  { %v563_v51 = vpop.eup %562  ;;  %v188_v54 = vmul.f32 %v561_v50, %v176_v49 }
  0xf2   :  { %v565_v55 = vpop.eup %564  ;;  %v185_v61 = vmul.f32 %v563_v51, %v173_v56 }
  0xf3   :  { %v192_v57 = vsub.f32 %v154_v26, %v188_v54  ;;  %v187_v58 = vmul.f32 %v565_v55, %v175_v53  ;;  %v360_v53 = vpop.permute.xlu0 %359 }
  0xf4   :  { %v189_v63 = vsub.f32 %v139_v23, %v185_v61 }
  0xf5   :  { %519 = vmatprep.subr.mxu1 %v192_v57  ;;  %v191_v60 = vsub.f32 %v149_v30, %v187_v58 }
  0xf6   :  { %520 = vmatpush3.msra.mxu1 %v192_v57 }
  0xf7   :  { %521 = vmatprep.subr.mxu1 %v191_v60 }
  0xf8   :  { %522 = vmatpush3.msra.mxu1 %v191_v60 }
  0xf9   :  { %523 = vmatprep.subr.mxu1 %v190_v62 }
  0xfa   :  { %524 = vmatpush3.msra.mxu1 %v190_v62 }
  0xfb   :  { %525 = vmatprep.subr.mxu1 %v189_v63 }
  0xfc   :  { %526 = vmatpush3.msra.mxu1 %v189_v63 }
  0xfd   :  { %528 = vmatmul.mubr.msk.f32.vlgmr.msra.gmra.mxu1 %vm221_vm1, %v194_v0 }
  0xfe   :  { %530 = vmatprep.mubr.msk.f32.mxu1 %vm221_vm1, %v195_v1 }
 0x101   :  { %531 = vmatmul.mubr.msk.f32.gmra.mxu1 %vm221_vm1, %v196_v2 }
 0x1bd   :  { %v529_v7 = vpop.f32.mrf.mxu1 }
 0x1be   :  { %v306_v8 = vadd.f32 %v529_v7, %v209_v6 }
 0x1bf   :  { %v300_v10 = vpop.f32.mrf.mxu1 }
 0x1c0   :  { %v321_v11 = vmul.f32 1.442695, %v306_v8  ;;  %v301_v12 = vadd.f32 %v300_v10, %v204_v9  ;;  %v336_v40 = vmul.f32 2.0, %v306_v8 }
 0x1c1   :  { %v532_v13 = vpop.f32.mrf.mxu1 }
 0x1c2   :  { %566 = vpow2.f32 %v321_v11  ;;  %v319_v14 = vmul.f32 1.442695, %v301_v12  ;;  %v316_v15 = vadd.f32 %v532_v13, %v219_v4  ;;  %v335_v45 = vmul.f32 2.0, %v301_v12 }
 0x1c3   :  { %v310_v16 = vpop.f32.mrf.mxu1 }
 0x1c4   :  { %568 = vpow2.f32 %v319_v14  ;;  %v325_v17 = vmul.f32 1.442695, %v316_v15  ;;  %v311_v18 = vadd.f32 %v310_v16, %v214_v5  ;;  %v338_v37 = vmul.f32 2.0, %v316_v15 }
 0x1c6   :  { %570 = vpow2.f32 %v325_v17  ;;  %v323_v19 = vmul.f32 1.442695, %v311_v18  ;;  %v337_v42 = vmul.f32 2.0, %v311_v18 }
 0x1c8   :  { %572 = vpow2.f32 %v323_v19 }
 0x1cf   :  { %v567_v20 = vpop.eup %566 }
 0x1d0   :  { %v328_v21 = vadd.f32 2.0, %v567_v20 }
 0x1d1   :  { %v569_v22 = vpop.eup %568 }
 0x1d2   :  { %v332_v23 = vmul.f32 %v567_v20, %v328_v21  ;;  %v327_v24 = vadd.f32 2.0, %v569_v22 }
 0x1d3   :  { %v571_v25 = vpop.eup %570 }
 0x1d4   :  { %v331_v26 = vmul.f32 %v569_v22, %v327_v24  ;;  %v330_v27 = vadd.f32 2.0, %v571_v25  ;;  %v340_v29 = vadd.f32 2.0, %v332_v23 }
 0x1d5   :  { %v573_v28 = vpop.eup %572 }
 0x1d6   :  { %v334_v30 = vmul.f32 %v571_v25, %v330_v27  ;;  %v329_v31 = vadd.f32 2.0, %v573_v28  ;;  %v339_v32 = vadd.f32 2.0, %v331_v26  ;;  %574 = vrcp.f32 %v340_v29 }
 0x1d8   :  { %v342_v33 = vadd.f32 2.0, %v334_v30  ;;  %v333_v34 = vmul.f32 %v573_v28, %v329_v31 }
 0x1da   :  { %576 = vrcp.f32 %v342_v33  ;;  %v341_v35 = vadd.f32 2.0, %v333_v34 }
 0x1db   :  { %578 = vrcp.f32 %v339_v32 }
 0x1dc   :  { %580 = vrcp.f32 %v341_v35 }
 0x1e3   :  { %v575_v36 = vpop.eup %574 }
 0x1e4   :  { %v348_v44 = vmul.f32 %v575_v36, %v336_v40 }
 0x1e6   :  { %v352_v50 = vsub.f32 %v306_v8, %v348_v44 }
 0x1e7   :  { %v577_v38 = vpop.eup %576 }
 0x1e8   :  { %v579_v39 = vpop.eup %578  ;;  %v350_v41 = vmul.f32 %v577_v38, %v338_v37 }
 0x1e9   :  { %v581_v43 = vpop.eup %580  ;;  %v347_v48 = vmul.f32 %v579_v39, %v335_v45 }
 0x1ea   :  { %v354_v46 = vsub.f32 %v316_v15, %v350_v41  ;;  %v349_v47 = vmul.f32 %v581_v43, %v337_v42 }
 0x1eb   :  { %v351_v51 = vsub.f32 %v301_v12, %v347_v48 }
 0x1ec   :  { %v353_v49 = vsub.f32 %v311_v18, %v349_v47  ;;  %534 = vmatpush3.msra.mxu0 %v354_v46 }
 0x1ed   :  { %535 = vmatprep.subr.mxu0 %v605_v3 }
 0x1ee   :  { %536 = vmatpush3.msra.mxu0 %v353_v49 }
 0x1ef   :  { %537 = vmatprep.subr.mxu0 %v605_v3 }
 0x1f0   :  { %538 = vmatpush3.msra.mxu0 %v352_v50 }
 0x1f1   :  { %539 = vmatprep.subr.mxu0 %v605_v3 }
 0x1f2   :  { %540 = vmatpush3.msra.mxu0 %v351_v51 }
 0x1f3   :  { %542 = vmatmul.mubr.msk.f32.vlgmr.msra.gmra.mxu0 %vm221_vm1, %v355_v52 }
 0x2b3   :  { %v431_v54 = vpop.f32.mrf.mxu0 }
 0x2b4   :  { %v432_v55 = vadd.f32 %v431_v54, %v360_v53 }
 0x2b5   :  { %v543_v56 = vpop.f32.mrf.mxu0 }
 0x2b6   :  { %435 = vxpose.xlu1.b32.start.end [1/1] (short) (narrow) %v432_v55, 8 }
 0x332   :  { %v451_v57 = vpop.trf.xlu1 }
 0x333   :  { %468 = vst.msk [vmem:[#allocation2] sm:$0xff] %vm467_vm3, %v451_v57 }
 0x334   :  { %593 = shalt.err (!%p590_p4)
}
 0x335   :  { %478 = dma.vmem_to_hbm [thread:$0]  %s476_s10, 128, %s731_s7, [#allocation3]  }
 0x336   :  { %602 = dma.done.wait [#allocation3], 128  }
 0x337   :  { %603 = vsyncadd [#allocation3], 4294967168 }
 0x338   :  { %482 = vsyncpa [#allocation3], 1 }

</bundles_post_ra>
